<compile_context>
chip_gen: v5e
topology: v5e:2x2
jax: 0.10.0
libtpu: 0.0.40
codegen_flags: <defaults>
</compile_context>

<pallas_src>
import math

import jax
import jax.numpy as jnp
from jax.experimental import pallas as pl
from jax.experimental.pallas import tpu as pltpu


# ------------------------------ helpers ------------------------------------ #
def _round_up(x, m):
    return (x + m - 1) // m * m


def _lcm(a, b):
    return a * b // math.gcd(a, b)


def _sublane_granule(dtype):
    # second-to-last block dim granularity: 8 (f32), 16 (bf16/f16), 32 (int8/fp8)
    return max(8, 32 // jnp.dtype(dtype).itemsize)


# ------------------------------ kernels ------------------------------------ #
def _make_flat_kernel(has_cw, has_w):
    """codewise=True: pure elementwise on lane-dense (Tm, L) blocks."""

    def kernel(*refs):
        i = 0
        cw_ref = None
        w_ref = None
        if has_cw:
            cw_ref = refs[i]
            i += 1
        if has_w:
            w_ref = refs[i]
            i += 1
        pred_ref, tgt_ref, out_ref = refs[i], refs[i + 1], refs[i + 2]

        diff = pred_ref[...].astype(jnp.float32) - tgt_ref[...].astype(jnp.float32)
        if has_cw:
            diff = diff * cw_ref[...]            # (1, L) sublane-broadcast
        loss = jnp.abs(diff)
        if has_w:
            loss = loss * w_ref[...].astype(jnp.float32)
        out_ref[...] = loss.astype(out_ref.dtype)

    return kernel


def _make_reduced_kernel(has_cw, has_w):
    """codewise=False: sum |cw*diff| over code dim, lane-dense reduced output."""

    def kernel(*refs):
        i = 0
        cw_ref = None
        w_ref = None
        if has_cw:
            cw_ref = refs[i]
            i += 1
        if has_w:
            w_ref = refs[i]
            i += 1
        pred_ref, tgt_ref, out_ref = refs[i], refs[i + 1], refs[i + 2]

        # pred/tgt blocks: (1, Ta, C); cw: (1, 1, C); w/out: (1, 1, Ta)
        diff = pred_ref[...].astype(jnp.float32) - tgt_ref[...].astype(jnp.float32)
        if has_cw:
            diff = diff * cw_ref[...]
        red = jnp.sum(jnp.abs(diff), axis=2)     # (1, Ta)
        red = red[:, None, :]                    # (1, 1, Ta) -> lane-dense store
        if has_w:
            red = red * w_ref[...].astype(jnp.float32)
        out_ref[...] = red.astype(out_ref.dtype)

    return kernel


# ------------------------------ wrappers ------------------------------------ #
def _wl1_codewise(pred, tgt, w, cw, B, A, C, out_dtype):
    has_cw = cw is not None
    has_w = w is not None
    total = B * A * C

    # Lane-dense layout: flatten and view as (M, L).  L is a multiple of C so
    # the code_weights pattern repeats identically on every row, and a multiple
    # of 128 so every store is an unmasked full-lane vst.  L is kept minimal so
    # total % L == 0 for common shapes (-> zero wrapper pad copies).
    L = _lcm(C, 128)
    pad = (-total) % L
    M = (total + pad) // L

    dtypes = [pred.dtype, tgt.dtype, out_dtype] + ([w.dtype] if has_w else [])
    g = max(_sublane_granule(dt) for dt in dtypes)

    # ~1 MiB (f32 equivalent) per stream per block; partial last row-block is
    # handled by the cdiv grid (Pallas masks OOB writes), no row padding.
    cap = max(g, ((1 << 20) // (4 * L)) // g * g)
    Tm = max(g, min(cap, _round_up(M, g)))
    grid = (pl.cdiv(M, Tm),)

    def _flat2d(x):
        xf = x.reshape(-1)
        if pad:
            xf = jnp.pad(xf, (0, pad))
        return xf.reshape(M, L)

    inputs = []
    in_specs = []
    if has_cw:
        cw_row = jnp.tile(cw, L // C).reshape(1, L)          # tiny, VMEM-resident
        inputs.append(cw_row)
        in_specs.append(pl.BlockSpec((1, L), lambda i: (0, 0)))
    if has_w:
        # TODO(synk): expand (B, A) weights across C in-kernel (lane upsample)
        # to drop this extra HBM stream (~40% of remaining traffic).
        w_exp = jnp.broadcast_to(w[:, :, None], (B, A, C))
        inputs.append(_flat2d(w_exp))
        in_specs.append(pl.BlockSpec((Tm, L), lambda i: (i, 0)))

    inputs.append(_flat2d(pred))
    in_specs.append(pl.BlockSpec((Tm, L), lambda i: (i, 0)))
    inputs.append(_flat2d(tgt))
    in_specs.append(pl.BlockSpec((Tm, L), lambda i: (i, 0)))

    out_spec = pl.BlockSpec((Tm, L), lambda i: (i, 0))

    elem = M * L
    bytes_accessed = sum(int(x.size) * x.dtype.itemsize for x in inputs)
    bytes_accessed += elem * jnp.dtype(out_dtype).itemsize
    cost = pl.CostEstimate(flops=(2 + int(has_cw) + int(has_w)) * elem,
                           transcendentals=0,
                           bytes_accessed=int(bytes_accessed))

    out2d = pl.pallas_call(
        _make_flat_kernel(has_cw, has_w),
        out_shape=jax.ShapeDtypeStruct((M, L), out_dtype),
        grid=grid,
        in_specs=in_specs,
        out_specs=out_spec,
        compiler_params=pltpu.CompilerParams(
            dimension_semantics=("parallel",)),
        cost_estimate=cost,
    )(*inputs)

    out = out2d.reshape(-1)
    if pad:
        out = out[:total]
    return out.reshape(B, A, C)


def _wl1_reduced(pred, tgt, w, cw, B, A, C, out_dtype):
    has_cw = cw is not None
    has_w = w is not None

    MAX_TA = 2048                      # anchors per tile (VMEM-safe on v7x too)
    Ta = A if A <= MAX_TA else MAX_TA  # A<=MAX_TA -> full-extent block (exempt);
    grid = (B, pl.cdiv(A, Ta))         # else cdiv grid, partial last block masked

    inputs = []
    in_specs = []
    if has_cw:
        inputs.append(cw.reshape(1, 1, C))
        in_specs.append(pl.BlockSpec((1, 1, C), lambda b, t: (0, 0, 0)))
    if has_w:
        inputs.append(w.reshape(B, 1, A))          # lane-dense weights blocks
        in_specs.append(pl.BlockSpec((1, 1, Ta), lambda b, t: (b, 0, t)))

    inputs.append(pred)
    in_specs.append(pl.BlockSpec((1, Ta, C), lambda b, t: (b, t, 0)))
    inputs.append(tgt)
    in_specs.append(pl.BlockSpec((1, Ta, C), lambda b, t: (b, t, 0)))

    out_spec = pl.BlockSpec((1, 1, Ta), lambda b, t: (b, 0, t))  # lane-dense out

    elem = B * A * C
    bytes_accessed = sum(int(x.size) * x.dtype.itemsize for x in inputs)
    bytes_accessed += B * A * jnp.dtype(out_dtype).itemsize
    cost = pl.CostEstimate(flops=4 * elem, transcendentals=0,
                           bytes_accessed=int(bytes_accessed))

    out = pl.pallas_call(
        _make_reduced_kernel(has_cw, has_w),
        out_shape=jax.ShapeDtypeStruct((B, 1, A), out_dtype),
        grid=grid,
        in_specs=in_specs,
        out_specs=out_spec,
        compiler_params=pltpu.CompilerParams(
            dimension_semantics=("parallel", "parallel")),
        cost_estimate=cost,
    )(*inputs)

    return out[:, 0, :]


def weighted_l1_loss(prediction, target, weights=None, code_weights=None,
                     codewise=True):
    """Pallas implementation of WeightedL1Loss.forward.

    prediction/target: [B, A, C]; weights: [B, A]; code_weights: [C].
    (reduction / loss_weight are unused in the reference forward.)
    """
    prediction = jnp.asarray(prediction)
    target = jnp.asarray(target)
    B, A, C = prediction.shape

    # dtype promotion mirrors torch: (pred - tgt), then *f32 code_weights.
    out_dtype = jnp.result_type(prediction.dtype, target.dtype)
    if code_weights is not None:
        out_dtype = jnp.result_type(out_dtype, jnp.float32)

    cw = None
    if code_weights is not None:
        cw = jnp.asarray(code_weights, dtype=jnp.float32).reshape(C)
    w = None
    if weights is not None:
        w = jnp.asarray(weights).reshape(B, A)

    if codewise:
        return _wl1_codewise(prediction, target, w, cw, B, A, C, out_dtype)
    return _wl1_reduced(prediction, target, w, cw, B, A, C, out_dtype)


# --------------------------- reference (JAX) ------------------------------- #
def _reference(prediction, target, weights, code_weights, codewise=True):
    diff = prediction - target
    if code_weights is not None:
        diff = jnp.asarray(code_weights, jnp.float32).reshape(1, 1, -1) * diff
    loss = jnp.abs(diff)
    if codewise:
        out = loss
        if weights is not None:
            out = out * weights[..., None]
    else:
        out = jnp.sum(loss, axis=2)
        if weights is not None:
            out = out * weights
    return out


if __name__ == "__main__":
    key = jax.random.PRNGKey(0)
    k1, k2, k3 = jax.random.split(key, 3)

    B, A, C = 2, 128, 8  # batch_size, num_anchors, code_size
    prediction = jax.random.normal(k1, (B, A, C), dtype=jnp.float32)
    target = jax.random.normal(k2, (B, A, C), dtype=jnp.float32)
    weights = jax.random.uniform(k3, (B, A), dtype=jnp.float32)
    code_weights = jnp.linspace(0.5, 1.5, C, dtype=jnp.float32)

    # codewise=True (default) path
    out = jax.block_until_ready(
        weighted_l1_loss(prediction, target, weights,
                         code_weights=code_weights, codewise=True))
    ref = _reference(prediction, target, weights, code_weights, codewise=True)
    assert out.shape == (B, A, C)
    assert jnp.allclose(out, ref, atol=1e-6, rtol=1e-6)

    # codewise=False reduction path
    out2 = jax.block_until_ready(
        weighted_l1_loss(prediction, target, weights,
                         code_weights=code_weights, codewise=False))
    ref2 = _reference(prediction, target, weights, code_weights, codewise=False)
    assert out2.shape == (B, A)
    assert jnp.allclose(out2, ref2, atol=1e-5, rtol=1e-5)

    # weights=None / code_weights=None variant (skips those streams entirely)
    out3 = jax.block_until_ready(
        weighted_l1_loss(prediction, target, None, None, codewise=True))
    ref3 = _reference(prediction, target, None, None, codewise=True)
    assert jnp.allclose(out3, ref3, atol=1e-6, rtol=1e-6)

    print("KERNEL_OK")
</pallas_src>

<mosaic_0001>
module attributes {stable_mosaic.version = 11 : i64} {
  func.func @kernel(%arg0: i32, %arg1: memref<1x128xf32, #tpu.memory_space<vmem>>, %arg2: memref<16x128xf32, #tpu.memory_space<vmem>>, %arg3: memref<16x128xf32, #tpu.memory_space<vmem>>, %arg4: memref<16x128xf32, #tpu.memory_space<vmem>>, %arg5: memref<16x128xf32, #tpu.memory_space<vmem>>) attributes {dimension_semantics = [#tpu.dimension_semantics<parallel>], iteration_bounds = array<i64: 1>, scalar_prefetch = 0 : i64, scratch_operands = 0 : i64, tpu.core_type = #tpu.core_type<tc>, window_params = [{pipeline_mode = #tpu.pipeline_mode<synchronous>, transform_indices = @transform_0, window_bounds = array<i64: 1, 128>}, {transform_indices = @transform_1, window_bounds = array<i64: 16, 128>}, {transform_indices = @transform_2, window_bounds = array<i64: 16, 128>}, {transform_indices = @transform_3, window_bounds = array<i64: 16, 128>}, {transform_indices = @transform_4, window_bounds = array<i64: 16, 128>}]} {
    %c0 = arith.constant 0 : index
    %c0_0 = arith.constant 0 : index
    %0 = vector.load %arg3[%c0, %c0_0] : memref<16x128xf32, #tpu.memory_space<vmem>>, vector<16x128xf32>
    %c0_1 = arith.constant 0 : index
    %c0_2 = arith.constant 0 : index
    %1 = vector.load %arg4[%c0_1, %c0_2] : memref<16x128xf32, #tpu.memory_space<vmem>>, vector<16x128xf32>
    %2 = arith.subf %0, %1 : vector<16x128xf32>
    %c0_3 = arith.constant 0 : index
    %c0_4 = arith.constant 0 : index
    %3 = vector.load %arg1[%c0_3, %c0_4] : memref<1x128xf32, #tpu.memory_space<vmem>>, vector<1x128xf32>
    %4 = vector.broadcast %3 : vector<1x128xf32> to vector<16x128xf32>
    %5 = arith.mulf %2, %4 : vector<16x128xf32>
    %6 = math.absf %5 : vector<16x128xf32>
    %c0_5 = arith.constant 0 : index
    %c0_6 = arith.constant 0 : index
    %7 = vector.load %arg2[%c0_5, %c0_6] : memref<16x128xf32, #tpu.memory_space<vmem>>, vector<16x128xf32>
    %8 = arith.mulf %6, %7 : vector<16x128xf32>
    %c0_7 = arith.constant 0 : index
    %c0_8 = arith.constant 0 : index
    %9 = vector.load %arg5[%c0_7, %c0_8] : memref<16x128xf32, #tpu.memory_space<vmem>>, vector<16x128xf32>
    tpu.vector_store %arg5[%c0_7, %c0_8], %8 {strides = array<i32>} : memref<16x128xf32, #tpu.memory_space<vmem>>, vector<16x128xf32>,
    return
  }
  func.func @transform_0(%arg0: i32) -> (i32, i32) {
    %c0_i32 = arith.constant 0 : i32
    %c0_i32_0 = arith.constant 0 : i32
    %c0_i32_1 = arith.constant 0 : i32
    return %c0_i32, %c0_i32_0 : i32, i32
  }
  func.func @transform_1(%arg0: i32) -> (i32, i32) {
    %c0_i32 = arith.constant 0 : i32
    %c0_i32_0 = arith.constant 0 : i32
    return %arg0, %c0_i32 : i32, i32
  }
  func.func @transform_2(%arg0: i32) -> (i32, i32) {
    %c0_i32 = arith.constant 0 : i32
    %c0_i32_0 = arith.constant 0 : i32
    return %arg0, %c0_i32 : i32, i32
  }
  func.func @transform_3(%arg0: i32) -> (i32, i32) {
    %c0_i32 = arith.constant 0 : i32
    %c0_i32_0 = arith.constant 0 : i32
    return %arg0, %c0_i32 : i32, i32
  }
  func.func @transform_4(%arg0: i32) -> (i32, i32) {
    %c0_i32 = arith.constant 0 : i32
    %c0_i32_0 = arith.constant 0 : i32
    return %arg0, %c0_i32 : i32, i32
  }
}

</mosaic_0001>

<bundles_post_ra>
// kernel: tpu_custom_call.1
= control target key start
LH: loop header
LB: loop body
LE: loop exit
PB: predicated region body
PF: predicated region fallthrough
CT: control target
= control target key end

     0   :  { %9 = vsyncpa [#allocation3], 0  ;;  %s315_s0 = inlined_call_operand.hbm [shape: f32[1,128], index: 0, kind: input, shape index: {}]   ;;  %s316_s1 = inlined_call_operand.hbm [shape: f32[16,128], index: 1, kind: input, shape index: {}]   ;;  %s317_s2 = inlined_call_operand.hbm [shape: f32[16,128], index: 2, kind: input, shape index: {}]   ;;  %s318_s3 = inlined_call_operand.hbm [shape: f32[16,128], index: 3, kind: input, shape index: {}]   ;;  %s319_s4 = inlined_call_operand.hbm [shape: f32[16,128], index: 4, kind: output, shape index: {}]  }
   0x1   :  { %10 = vsyncpa [#allocation6], 0 }
   0x2   :  { %11 = vsyncpa [#allocation9], 0  ;;  %s28_s17 = sshll.u32 %s316_s1, 4  ;;  %s29_s17 = int_to_ptr.hbm [resolvable:$true] %s28_s17 }
   0x3   :  { %12 = vsyncpa [#allocation4], 0  ;;  %s256_s18 = smov [#allocation5]   ;;  %s18_s22 = sshll.u32 %s315_s0, 4  ;;  %s19_s22 = int_to_ptr.hbm [resolvable:$true] %s18_s22 }
   0x4   :  { %s30_s19 = sshll.u32 %s256_s18, 4  ;;  %s257_s23 = smov 128   ;;  %s31_s19 = int_to_ptr.vmem [resolvable:$true] %s30_s19 }
   0x5   :  { %s258_s24 = smov 8   ;;  %s259_s25 = smov [#allocation2]  }
   0x6   :  { %36 = dma.hbm_to_vmem [thread:$0]  %s29_s17, 256, %s31_s19, [#allocation6], %s257_s23, %s257_s23, %s258_s24  }
   0x7   :  { %s20_s26 = sshll.u32 %s259_s25, 4  ;;  %s41_s28 = sshll.u32 %s317_s2, 4  ;;  %s21_s26 = int_to_ptr.vmem [resolvable:$true] %s20_s26  ;;  %s42_s28 = int_to_ptr.hbm [resolvable:$true] %s41_s28 }
   0x8   :  { %23 = dma.hbm_to_vmem [thread:$0]  %s19_s22, 16, %s21_s26, [#allocation3]  }
   0x9   :  { %s54_s0 = sshll.u32 %s318_s3, 4  ;;  %s260_s5 = smov [#allocation7]   ;;  %s55_s0 = int_to_ptr.hbm [resolvable:$true] %s54_s0 }
   0xa   :  { %s43_s6 = sshll.u32 %s260_s5, 4  ;;  %s261_s7 = smov [#allocation8]   ;;  %s44_s6 = int_to_ptr.vmem [resolvable:$true] %s43_s6 }
   0xb   :  { %49 = dma.hbm_to_vmem [thread:$0]  %s42_s28, 256, %s44_s6, [#allocation6], %s257_s23, %s257_s23, %s258_s24  }
   0xc   :  { %s56_s8 = sshll.u32 %s261_s7, 4  ;;  %s57_s8 = int_to_ptr.vmem [resolvable:$true] %s56_s8 }
   0xd   :  { %62 = dma.hbm_to_vmem [thread:$0]  %s55_s0, 256, %s57_s8, [#allocation9], %s257_s23, %s257_s23, %s258_s24  }
   0xe   :  { %248 = dma.done.wait [#allocation3], 16  }
   0xf   :  { %249 = vsyncadd [#allocation3], 4294967280 }
  0x10   :  { %250 = dma.done.wait [#allocation6], 512  }
  0x11   :  { %251 = vsyncadd [#allocation6], 4294966784 }
  0x12   :  { %252 = dma.done.wait [#allocation9], 256  }
  0x13   :  { %253 = vsyncadd [#allocation9], 4294967040  ;;  %v79_v0 = vld [vmem:[#allocation7] sm:$0xff]  ;;  %v81_v1 = vld [vmem:[#allocation8] sm:$0xff]  ;;  %s262_s2 = smov [#allocation10]   ;;  %s105_s11 = sshll.u32 %s319_s4, 4  ;;  %s106_s11 = int_to_ptr.hbm [resolvable:$true] %s105_s11 }
  0x14   :  { %v83_v2 = vsub.f32 %v79_v0, %v81_v1  ;;  %v127_v3 = vld [vmem:[#allocation2] ss:$0 sm:$0xff]  ;;  %v82_v5 = vld [vmem:[#allocation8 + $0x8] sm:$0xff]  ;;  %v93_v8 = vld [vmem:[#allocation5] sm:$0xff]  ;;  %s103_s3 = sshll.u32 %s262_s2, 4  ;;  %s104_s3 = int_to_ptr.vmem [resolvable:$true] %s103_s3 }
  0x15   :  { %v80_v4 = vld [vmem:[#allocation7 + $0x8] sm:$0xff]  ;;  %v94_v11 = vld [vmem:[#allocation5 + $0x8] sm:$0xff] }
  0x16   :  { %v89_v6 = vmul.f32 %v127_v3, %v83_v2  ;;  %v84_v7 = vsub.f32 %v80_v4, %v82_v5 }
  0x18   :  { %v91_v9 = vand.u32 2147483647, %v89_v6  ;;  %v90_v10 = vmul.f32 %v127_v3, %v84_v7 }
  0x1a   :  { %v95_v12 = vmul.f32 %v93_v8, %v91_v9  ;;  %v92_v13 = vand.u32 2147483647, %v90_v10 }
  0x1c   :  { %97 = vst [vmem:[#allocation10] sm:$0xff] %v95_v12  ;;  %v96_v14 = vmul.f32 %v94_v11, %v92_v13 }
  0x1e   :  { %98 = vst [vmem:[#allocation10 + $0x8] sm:$0xff] %v96_v14 }
  0x1f   :  { %111 = dma.vmem_to_hbm [thread:$0]  %s104_s3, 256, %s106_s11, [#allocation4], %s257_s23, %s257_s23, %s258_s24  }
  0x20   :  { %254 = dma.done.wait [#allocation4], 256  }
  0x21   :  { %255 = vsyncadd [#allocation4], 4294967040 }
  0x22   :  { %116 = vsyncpa [#allocation3], 1 }
  0x23   :  { %117 = vsyncpa [#allocation6], 1 }
  0x24   :  { %118 = vsyncpa [#allocation9], 1 }
  0x25   :  { %119 = vsyncpa [#allocation4], 1 }

</bundles_post_ra>
